<compile_context>
chip_gen: v6e
topology: v6e:2x2x1
jax: 0.10.0
libtpu: 0.0.40
codegen_flags: <defaults>
</compile_context>

<pallas_src>
import jax
import jax.numpy as jnp
from jax.experimental import pallas as pl
from jax.experimental.pallas import tpu as pltpu


def _round_up(x: int, m: int) -> int:
    return ((x + m - 1) // m) * m


def _matmul_nt_single_kernel(q_ref, v_ref, o_ref):
    """One (tm, tn) tile of query @ value.T, single reduction step.

    No accumulator scratch: the dot result is cast and stored directly.
    """
    o_ref[...] = jax.lax.dot_general(
        q_ref[...],
        v_ref[...],
        dimension_numbers=(((1,), (1,)), ((), ())),
        preferred_element_type=jnp.float32,
    ).astype(o_ref.dtype)


def _matmul_nt_acc_kernel(q_ref, v_ref, o_ref, acc_ref):
    """One (tm, tn) tile of query @ value.T, reducing over the k grid axis."""
    @pl.when(pl.program_id(2) == 0)
    def _():
        acc_ref[...] = jnp.zeros_like(acc_ref)

    # query @ value.T as a contraction on the LAST dim of both operands:
    # no in-kernel `.T`, so `value` feeds the MXU without an XLU relayout.
    acc_ref[...] += jax.lax.dot_general(
        q_ref[...],
        v_ref[...],
        dimension_numbers=(((1,), (1,)), ((), ())),
        preferred_element_type=jnp.float32,
    )

    @pl.when(pl.program_id(2) == pl.num_programs(2) - 1)
    def _():
        o_ref[...] = acc_ref[...].astype(o_ref.dtype)


def model_forward(query, key, value, dropout_p, inv_scale_factor,
                  *, tm_max=512, tn_max=1024, tk_max=1024):
    """Exact semantics of Model.forward: returns query @ value.T.

    query: (M, D), value: (N, D) -> output (M, N).
    """
    # TODO(synk): the qk / div / softmax / dropout branch of the reference
    # forward is dead (its result is overwritten before return), so it is
    # intentionally not computed here.
    del key, dropout_p, inv_scale_factor

    M, D = query.shape
    N, Dv = value.shape
    assert D == Dv, (D, Dv)

    dtype = query.dtype
    itemsize = jnp.dtype(dtype).itemsize
    sublane = max(8, 32 // itemsize)          # 8 f32, 16 bf16, 32 int8/fp8

    # Tile sizes: use the full dim when it fits the cap (satisfies the
    # "(8,128) or full dim" block constraint without padding); otherwise the
    # cap (a multiple of 128 / of the sublane count) with ragged edge tiles.
    tm = M if M <= tm_max else tm_max
    tn = N if N <= tn_max else tn_max
    tk = D if D <= tk_max else tk_max

    gi, gj = pl.cdiv(M, tm), pl.cdiv(N, tn)

    # Megacore guard: if the whole output would be a single tile but there is
    # enough work to matter, split M so both TensorCores (v7x) get a tile.
    if gi * gj == 1 and M >= 2 * sublane and (M * N * D) >= (1 << 21):
        tm = _round_up(pl.cdiv(M, 2), sublane)
        gi = pl.cdiv(M, tm)

    # Only the contraction dim must be zero-padded when tiled (out-of-bounds
    # K reads would corrupt valid outputs); M/N ragged tiles are safe because
    # their garbage rows/cols are masked on writeback.  This pad only happens
    # in the rare D > tk_max case.
    qp, vp = query, value
    if D > tk:
        Dp = _round_up(D, tk)
        if Dp != D:
            qp = jnp.pad(query, ((0, 0), (0, Dp - D)))
            vp = jnp.pad(value, ((0, 0), (0, Dp - D)))
        gk = Dp // tk
    else:
        gk = 1

    # Truthful streamed-traffic estimate: q re-read per N tile, v per M tile.
    cost = pl.CostEstimate(
        flops=2 * M * N * D,
        transcendentals=0,
        bytes_accessed=(M * D * gj + N * D * gi + M * N) * itemsize,
    )
    compiler_params = pltpu.CompilerParams(
        dimension_semantics=(("parallel", "parallel", "arbitrary") if gk > 1
                             else ("parallel", "parallel")),
        # Raise v5e's 16 MiB scoped default; stays well under v7x's 64 MiB.
        vmem_limit_bytes=48 * 1024 * 1024,
    )
    out_shape = jax.ShapeDtypeStruct((M, N), dtype)

    if gk == 1:
        # Common case: one reduction step -> no accumulator round-trip.
        return pl.pallas_call(
            _matmul_nt_single_kernel,
            out_shape=out_shape,
            grid_spec=pltpu.PrefetchScalarGridSpec(
                num_scalar_prefetch=0,
                grid=(gi, gj),
                in_specs=[
                    pl.BlockSpec((tm, tk), lambda i, j: (i, 0)),
                    pl.BlockSpec((tn, tk), lambda i, j: (j, 0)),
                ],
                out_specs=pl.BlockSpec((tm, tn), lambda i, j: (i, j)),
            ),
            compiler_params=compiler_params,
            cost_estimate=cost,
        )(qp, vp)

    return pl.pallas_call(
        _matmul_nt_acc_kernel,
        out_shape=out_shape,
        grid_spec=pltpu.PrefetchScalarGridSpec(
            num_scalar_prefetch=0,
            grid=(gi, gj, gk),
            in_specs=[
                pl.BlockSpec((tm, tk), lambda i, j, k: (i, k)),
                pl.BlockSpec((tn, tk), lambda i, j, k: (j, k)),
            ],
            out_specs=pl.BlockSpec((tm, tn), lambda i, j, k: (i, j)),
            scratch_shapes=[pltpu.VMEM((tm, tn), jnp.float32)],
        ),
        compiler_params=compiler_params,
        cost_estimate=cost,
    )(qp, vp)


if __name__ == "__main__":
    # Small deterministic inputs consistent with the forward's shape
    # requirements: query (M, D), key (N, D), value (N, D).
    M, N, D = 8, 8, 32
    k0 = jax.random.PRNGKey(0)
    kq, kk, kv = jax.random.split(k0, 3)
    query = jax.random.normal(kq, (M, D), dtype=jnp.float32)
    key = jax.random.normal(kk, (N, D), dtype=jnp.float32)
    value = jax.random.normal(kv, (N, D), dtype=jnp.float32)

    dropout_p = 1.0
    inv_scale_factor = 1.0

    out = model_forward(query, key, value, dropout_p, inv_scale_factor)
    out = jax.block_until_ready(out)

    # Pure-JAX reference check of the live computation.
    ref = query @ value.T
    assert out.shape == (M, N), out.shape
    assert jnp.allclose(out, ref, atol=1e-5, rtol=1e-5), "mismatch vs reference"

    # Secondary check exercising ragged M/N edge tiles, the D padding path,
    # and the multi-k-step accumulator kernel (tile caps shrunk on purpose).
    M2, N2, D2 = 100, 200, 160
    kq2, kk2, kv2 = jax.random.split(jax.random.PRNGKey(1), 3)
    q2 = jax.random.normal(kq2, (M2, D2), dtype=jnp.float32)
    k2 = jax.random.normal(kk2, (N2, D2), dtype=jnp.float32)
    v2 = jax.random.normal(kv2, (N2, D2), dtype=jnp.float32)
    out2 = jax.block_until_ready(
        model_forward(q2, k2, v2, dropout_p, inv_scale_factor,
                      tm_max=64, tn_max=128, tk_max=128))
    ref2 = jnp.matmul(q2, v2.T, precision=jax.lax.Precision.HIGHEST)
    assert out2.shape == (M2, N2), out2.shape
    assert jnp.allclose(out2, ref2, atol=1e-3, rtol=1e-3), "mismatch (tiled)"

    print("KERNEL_OK")
</pallas_src>

<mosaic_0001>
module attributes {stable_mosaic.version = 11 : i64} {
  func.func @_matmul_nt_single_kernel(%arg0: i32, %arg1: i32, %arg2: memref<8x32xf32, #tpu.memory_space<vmem>>, %arg3: memref<8x32xf32, #tpu.memory_space<vmem>>, %arg4: memref<8x8xf32, #tpu.memory_space<vmem>>) attributes {dimension_semantics = [#tpu.dimension_semantics<parallel>, #tpu.dimension_semantics<parallel>], iteration_bounds = array<i64: 1, 1>, scalar_prefetch = 0 : i64, scratch_operands = 0 : i64, tpu.core_type = #tpu.core_type<tc>, window_params = [{transform_indices = @transform_0, window_bounds = array<i64: 8, 32>}, {transform_indices = @transform_1, window_bounds = array<i64: 8, 32>}, {transform_indices = @transform_2, window_bounds = array<i64: 8, 8>}]} {
    %c0 = arith.constant 0 : index
    %c0_0 = arith.constant 0 : index
    %0 = vector.load %arg2[%c0, %c0_0] : memref<8x32xf32, #tpu.memory_space<vmem>>, vector<8x32xf32>
    %c0_1 = arith.constant 0 : index
    %c0_2 = arith.constant 0 : index
    %1 = vector.load %arg3[%c0_1, %c0_2] : memref<8x32xf32, #tpu.memory_space<vmem>>, vector<8x32xf32>
    %cst = arith.constant dense<0.000000e+00> : vector<8x8xf32>
    %2 = tpu.matmul %0, %1, %cst {dimension_numbers = #tpu.dot_dimension_numbers<[1], [1], [0], [0], [0, 0, 1, 0], [], []>} : vector<8x32xf32>, vector<8x32xf32>, vector<8x8xf32> -> vector<8x8xf32>
    %c0_3 = arith.constant 0 : index
    %c0_4 = arith.constant 0 : index
    %3 = vector.load %arg4[%c0_3, %c0_4] : memref<8x8xf32, #tpu.memory_space<vmem>>, vector<8x8xf32>
    tpu.vector_store %arg4[%c0_3, %c0_4], %2 {strides = array<i32>} : memref<8x8xf32, #tpu.memory_space<vmem>>, vector<8x8xf32>,
    return
  }
  func.func @transform_0(%arg0: i32, %arg1: i32) -> (i32, i32) {
    %c0_i32 = arith.constant 0 : i32
    %c0_i32_0 = arith.constant 0 : i32
    return %arg0, %c0_i32 : i32, i32
  }
  func.func @transform_1(%arg0: i32, %arg1: i32) -> (i32, i32) {
    %c0_i32 = arith.constant 0 : i32
    %c0_i32_0 = arith.constant 0 : i32
    return %arg1, %c0_i32 : i32, i32
  }
  func.func @transform_2(%arg0: i32, %arg1: i32) -> (i32, i32) {
    %c0_i32 = arith.constant 0 : i32
    return %arg0, %arg1 : i32, i32
  }
}

</mosaic_0001>

<bundles_post_ra>
// kernel: tpu_custom_call.1
= control target key start
LH: loop header
LB: loop body
LE: loop exit
PB: predicated region body
PF: predicated region fallthrough
CT: control target
= control target key end

     0   :  { %7 = vsyncpa [#allocation3], 0  ;;  %s242_s0 = inlined_call_operand.hbm [shape: f32[8,32], index: 0, kind: input, shape index: {}]   ;;  %s243_s1 = inlined_call_operand.hbm [shape: f32[8,32], index: 1, kind: input, shape index: {}]   ;;  %s244_s2 = inlined_call_operand.hbm [shape: f32[8,8], index: 2, kind: output, shape index: {}]  }
   0x1   :  { %8 = vsyncpa [#allocation6], 0 }
   0x2   :  { %9 = vsyncpa [#allocation4], 0  ;;  %s213_s9 = smov [#allocation2]   ;;  %s214_s11 = smov [#allocation5]  }
   0x3   :  { %s16_s10 = sshll.u32 %s213_s9, 4  ;;  %s26_s12 = sshll.u32 %s214_s11, 4  ;;  %s17_s10 = int_to_ptr.vmem [resolvable:$true] %s16_s10  ;;  %s27_s12 = int_to_ptr.vmem [resolvable:$true] %s26_s12 }
   0x4   :  { %s155_s13 = scalar_lea.vmem %s17_s10, 128  ;;  %p160_p1 = scmp.lt.s32.totalorder %s17_s10, %s17_s10 }
   0x5   :  { %p156_p0 = scmp.ne.s32.totalorder %s17_s10, %s155_s13  ;;  %p161_p2 = scmp.lt.s32.totalorder %s155_s13, %s155_s13 }
   0x7   :  { %p162_p3 = por %p161_p2, %p160_p1 }
   0x9   :  { %p163_p4 = pnand %p162_p3, %p156_p0 }
   0xb   :  { %166 = shalt.err (!%p163_p4)
}
   0xc   :  { %19 = dma.hbm_to_vmem [thread:$0]  %s242_s0, 128, %s17_s10, [#allocation3]  }
   0xd   :  { %s175_s16 = scalar_lea.vmem %s27_s12, 128  ;;  %p180_p6 = scmp.lt.s32.totalorder %s27_s12, %s27_s12 }
   0xe   :  { %p176_p5 = scmp.ne.s32.totalorder %s27_s12, %s175_s16  ;;  %p181_p7 = scmp.lt.s32.totalorder %s175_s16, %s175_s16 }
  0x10   :  { %p182_p8 = por %p181_p7, %p180_p6 }
  0x12   :  { %p183_p9 = pnand %p182_p8, %p176_p5 }
  0x14   :  { %186 = shalt.err (!%p183_p9)
}
  0x15   :  { %29 = dma.hbm_to_vmem [thread:$0]  %s243_s1, 128, %s27_s12, [#allocation6]  }
  0x16   :  { %207 = dma.done.wait [#allocation3], 128  }
  0x17   :  { %208 = vsyncadd [#allocation3], 4294967168 }
  0x18   :  { %209 = dma.done.wait [#allocation6], 128  }
  0x19   :  { %210 = vsyncadd [#allocation6], 4294967168  ;;  %v215_v0 = vmov 0.0   ;;  %vm216_vm0 = vmmov 0   ;;  %vm38_vm1 = vcmask 261120   ;;  %v37_v1 = vld [vmem:[#allocation5] sm:$0xff] }
  0x1a   :  { %137 = vmatprep.subr.mxu0 %v215_v0  ;;  %139 = vmatprep.mubr.msk.f32.mxu0 %vm216_vm0, %v215_v0  ;;  %v36_v2 = vld [vmem:[#allocation2] sm:$0xff]  ;;  %s217_s0 = smov [#allocation7]   ;;  %vm115_vm2 = vcmask 64512  }
  0x1b   :  { %138 = vmatpush3.xpose.msk.msra.mxu0 %vm38_vm1, %v37_v1  ;;  %s123_s19 = sshll.u32 %s217_s0, 4  ;;  %s124_s19 = int_to_ptr.vmem [resolvable:$true] %s123_s19 }
  0x1c   :  { %s187_s1 = scalar_lea.vmem %s124_s19, 128  ;;  %p192_p11 = scmp.lt.s32.totalorder %s124_s19, %s124_s19 }
  0x1d   :  { %p188_p10 = scmp.ne.s32.totalorder %s124_s19, %s187_s1  ;;  %p193_p12 = scmp.lt.s32.totalorder %s187_s1, %s187_s1 }
  0x1e   :  { %140 = vmatmul.mubr.msk.f32.vlgmr.msra.gmra.mxu0 %vm38_vm1, %v36_v2 }
  0x1f   :  { %p194_p13 = por %p193_p12, %p192_p11 }
  0x21   :  { %p195_p0 = pnand %p194_p13, %p188_p10 }
  0xde   :  { %v111_v3 = vpop.f32.mrf.mxu0 }
  0xdf   :  { %116 = vst.msk [vmem:[#allocation7] sm:$0xff] %vm115_vm2, %v111_v3 }
  0xe0   :  { %v141_v4 = vpop.f32.mrf.mxu0 }
  0xe1   :  { %198 = shalt.err (!%p195_p0)
}
  0xe2   :  { %126 = dma.vmem_to_hbm [thread:$0]  %s124_s19, 128, %s244_s2, [#allocation4]  }
  0xe3   :  { %211 = dma.done.wait [#allocation4], 128  }
  0xe4   :  { %212 = vsyncadd [#allocation4], 4294967168 }
  0xe5   :  { %130 = vsyncpa [#allocation3], 1 }
  0xe6   :  { %131 = vsyncpa [#allocation6], 1 }
  0xe7   :  { %132 = vsyncpa [#allocation4], 1 }

</bundles_post_ra>
